<compile_context>
chip_gen: v7x
topology: tpu7x:2x2x1
jax: 0.10.0
libtpu: 0.0.40
codegen_flags: <defaults>
</compile_context>

<pallas_src>
import functools

import jax
import jax.numpy as jnp
import numpy as np
from jax.experimental import pallas as pl
from jax.experimental.pallas import tpu as pltpu


def _round_up(x, m):
    return ((x + m - 1) // m) * m


@functools.lru_cache(maxsize=None)
def _vmem_limit_bytes():
    """~75% of per-core VMEM (48 MiB on v7x, 96 MiB on v5e/v6e)."""
    try:
        cap = pltpu.get_tpu_info().vmem_capacity_bytes
        return int(min(cap * 3 // 4, 100 * 1024 * 1024))
    except Exception:  # query unavailable -> conservative (fits every gen)
        return 48 * 1024 * 1024


def _pad_cast(x, rows, cols, dtype):
    r, c = x.shape
    return jnp.zeros((rows, cols), dtype).at[:r, :c].set(x.astype(dtype))


def _choose_tiles(n, tm, tk):
    """Clamp tiles for small graphs, keep them 128-aligned and nested
    (one divides the other) so a single padded N works for rows and K."""
    n128 = _round_up(n, 128)
    tm = max(128, min(_round_up(tm, 128), n128))
    tk = max(128, min(_round_up(tk, 128), n128))
    # v7x megacore: ensure >= 2 row tiles when the graph is big enough so the
    # "parallel" row axis actually feeds both TensorCores.
    if n128 >= 256 and tm >= n128:
        tm = _round_up(n128 // 2, 128)
    if tk >= tm:
        tk = (tk // tm) * tm
    else:
        tm = (tm // tk) * tk
    n_pad = _round_up(n128, max(tm, tk))
    return tm, tk, n_pad


# ------------------------------ Pallas kernel ------------------------------

def _gcn_layer_kernel(*refs, apply_relu, apply_w, m_resident, tk):
    """One GCN layer, one (row-tile i, K-tile k) grid step.

    acc_i   += A_hat[i, k] @ M[k]                (bf16 MXU, f32 accumulate)
    at k==last:
      H_i    = relu?( acc_i [@ W] + b )          (bf16 epilogue matmul)
      E_p[i] = P[:, rows_i] @ H_i                (partial global mean pool)
    """
    if apply_w:
        a_ref, m_ref, w_ref, b_ref, p_ref, h_ref, e_ref, acc_ref = refs
    else:
        a_ref, m_ref, b_ref, p_ref, h_ref, e_ref, acc_ref = refs
        w_ref = None

    k = pl.program_id(1)

    @pl.when(k == 0)
    def _():
        acc_ref[...] = jnp.zeros_like(acc_ref)

    if m_resident:
        # M is VMEM-resident (fetched once); slice the K block in-kernel.
        start = pl.multiple_of(k * tk, tk)
        m_blk = m_ref[pl.ds(start, tk), :]
    else:
        m_blk = m_ref[...]

    acc_ref[...] += jnp.dot(a_ref[...], m_blk,
                            preferred_element_type=jnp.float32)

    @pl.when(k == pl.num_programs(1) - 1)
    def _():
        acc = acc_ref[...]
        if apply_w:
            # bf16 x bf16 MXU matmul (f32 x f32 would lower to slow multipass)
            h = jnp.dot(acc.astype(jnp.bfloat16), w_ref[...],
                        preferred_element_type=jnp.float32) + b_ref[...]
        else:
            h = acc + b_ref[...]
        if apply_relu:
            h = jnp.maximum(h, 0.0)
        h_ref[...] = h.astype(h_ref.dtype)   # bf16 writeback, carried padded
        # Fold pooling into the row-tile loop while H_i is still hot in VMEM.
        e_ref[...] = jnp.dot(p_ref[...], h,
                             preferred_element_type=jnp.float32
                             )[None].astype(e_ref.dtype)


def gcn_layer(a_p, m_p, w_p, b_p, p_p, *, apply_relu, tm, tk):
    """One GCNConv layer + fused global mean pool on pre-padded operands.

    a_p : (N_pad, N_pad) bf16 normalized adjacency (zero-padded)
    m_p : (N_pad, C_pad) bf16 features (= X or X @ W, zero-padded cols)
    w_p : (C_pad, F_pad) bf16 or None (weight applied in-kernel when present)
    b_p : (1, F_pad) f32 bias, p_p : (G, N_pad) f32 mean-pool matrix.

    Returns (H_pad bf16 (N_pad, F_pad), E_partials f32 (row_tiles, G, F_pad)).
    """
    n_pad = a_p.shape[0]
    c_pad = m_p.shape[1]
    fout_pad = b_p.shape[1]
    g = p_p.shape[0]
    apply_w = w_p is not None

    n_row_tiles = n_pad // tm
    n_k_tiles = n_pad // tk

    # Keep M VMEM-resident (single DMA) when it comfortably fits even on
    # v7x's 64 MiB/TC; otherwise stream a (tk, C_pad) slab per K step.
    m_resident = (n_pad * c_pad * 2) <= min(8 * 1024 * 1024,
                                            _vmem_limit_bytes() // 6)

    inputs = [a_p, m_p]
    in_specs = [pl.BlockSpec((tm, tk), lambda i, k: (i, k))]          # A tile
    if m_resident:
        in_specs.append(pl.BlockSpec((n_pad, c_pad), lambda i, k: (0, 0)))
    else:
        in_specs.append(pl.BlockSpec((tk, c_pad), lambda i, k: (k, 0)))
    if apply_w:
        inputs.append(w_p)
        in_specs.append(pl.BlockSpec((c_pad, fout_pad), lambda i, k: (0, 0)))
    inputs += [b_p, p_p]
    in_specs += [
        pl.BlockSpec((1, fout_pad), lambda i, k: (0, 0)),             # bias
        pl.BlockSpec((g, tm), lambda i, k: (0, i)),                   # pool
    ]

    flops = 2 * n_pad * n_pad * c_pad + 2 * g * n_pad * fout_pad
    if apply_w:
        flops += 2 * n_pad * c_pad * fout_pad
    bytes_accessed = (n_pad * n_pad * 2
                      + n_pad * c_pad * 2 * (1 if m_resident else n_row_tiles)
                      + (c_pad * fout_pad * 2 if apply_w else 0)
                      + fout_pad * 4 + g * n_pad * 4
                      + n_pad * fout_pad * 2
                      + n_row_tiles * g * fout_pad * 4)

    kernel = functools.partial(_gcn_layer_kernel, apply_relu=apply_relu,
                               apply_w=apply_w, m_resident=m_resident, tk=tk)

    h_p, e_parts = pl.pallas_call(
        kernel,
        out_shape=(jax.ShapeDtypeStruct((n_pad, fout_pad), jnp.bfloat16),
                   jax.ShapeDtypeStruct((n_row_tiles, g, fout_pad),
                                        jnp.float32)),
        grid_spec=pltpu.PrefetchScalarGridSpec(
            num_scalar_prefetch=0,
            grid=(n_row_tiles, n_k_tiles),
            in_specs=in_specs,
            out_specs=(
                pl.BlockSpec((tm, fout_pad), lambda i, k: (i, 0)),
                pl.BlockSpec((1, g, fout_pad), lambda i, k: (i, 0, 0)),
            ),
            scratch_shapes=[pltpu.VMEM((tm, c_pad), jnp.float32)]),
        compiler_params=pltpu.CompilerParams(
            dimension_semantics=("parallel", "arbitrary"),
            vmem_limit_bytes=_vmem_limit_bytes()),
        cost_estimate=pl.CostEstimate(flops=flops, transcendentals=0,
                                      bytes_accessed=bytes_accessed),
    )(*inputs)
    return h_p, e_parts


# ------------------------- plain-JAX glue (graph prep) -------------------------

def build_normalized_adjacency(edge_index, edge_weight, num_nodes):
    """Dense PyG gcn_norm: add self-loops (w=1), symmetric D^-1/2 normalization."""
    row, col = edge_index[0], edge_index[1]
    loop_idx = jnp.arange(num_nodes, dtype=edge_index.dtype)
    row = jnp.concatenate([row, loop_idx])
    col = jnp.concatenate([col, loop_idx])
    ew = jnp.concatenate(
        [edge_weight, jnp.ones((num_nodes,), edge_weight.dtype)])
    deg = jnp.zeros((num_nodes,), ew.dtype).at[col].add(ew)
    deg_inv_sqrt = jnp.where(deg > 0, 1.0 / jnp.sqrt(deg), 0.0)
    norm = deg_inv_sqrt[row] * ew * deg_inv_sqrt[col]
    a_hat = jnp.zeros((num_nodes, num_nodes), ew.dtype).at[col, row].add(norm)
    return a_hat


def build_mean_pool_matrix(batch, num_graphs):
    """P[g, n] = 1/|graph g| if node n belongs to graph g (global_mean_pool)."""
    one_hot = (batch[None, :] == jnp.arange(num_graphs)[:, None]).astype(
        jnp.float32)
    counts = jnp.maximum(one_hot.sum(axis=1, keepdims=True), 1.0)
    return one_hot / counts


class GCNBlock:
    """Mirror of the PyTorch GCNBlock (deterministic synthetic params).

    bf16 is used for all N^2-scale streams (documented precision choice for
    inference); f32 accumulation / epilogue keeps error ~1e-2 relative.
    """

    def __init__(self, gcn_layers_dim, key, dropout_rate=0.0,
                 relu_layers_index=(), dropout_layers_index=()):
        self.relu_layers_index = set(relu_layers_index)
        self.dropout_layers_index = set(dropout_layers_index)
        self.dropout_rate = dropout_rate
        self.weights = []
        self.biases = []
        for i in range(len(gcn_layers_dim) - 1):
            key, sub = jax.random.split(key)
            fin, fout = gcn_layers_dim[i], gcn_layers_dim[i + 1]
            limit = (6.0 / (fin + fout)) ** 0.5  # glorot-uniform (PyG GCNConv)
            w = jax.random.uniform(sub, (fin, fout), jnp.float32, -limit, limit)
            self.weights.append(w)
            self.biases.append(jnp.zeros((1, fout), jnp.float32))

    def __call__(self, x, edge_index, edge_weight, batch, num_graphs=None,
                 tile_m=512, tile_k=1024):
        num_nodes = x.shape[0]
        if num_graphs is None:
            # Fallback only: forces a device->host sync; pass it statically.
            num_graphs = int(batch.max()) + 1

        a_hat = build_normalized_adjacency(edge_index, edge_weight, num_nodes)
        pool = build_mean_pool_matrix(batch, num_graphs)

        tm, tk, n_pad = _choose_tiles(num_nodes, tile_m, tile_k)

        # Hoisted, once-per-forward padding + bf16 cast of the N^2 operand
        # and the pool matrix (reused by every layer).
        a_p = _pad_cast(a_hat, n_pad, n_pad, jnp.bfloat16)
        p_p = _pad_cast(pool, num_graphs, n_pad, jnp.float32)

        # Node features carried padded + bf16 between layers (no slice/re-pad
        # round trips). Padded A/P columns are zero, so garbage in padded H
        # rows never leaks into results.
        fin0 = x.shape[1]
        h_pad = _pad_cast(x, n_pad, _round_up(fin0, 128), jnp.bfloat16)

        embeddings = []
        for i, (w, b) in enumerate(zip(self.weights, self.biases)):
            fin, fout = w.shape
            fin_pad = _round_up(fin, 128)
            fout_pad = _round_up(fout, 128)
            w_pad = _pad_cast(w, fin_pad, fout_pad, jnp.bfloat16)
            b_pad = _pad_cast(b, 1, fout_pad, jnp.float32)

            # Matmul association: run the N^2 propagation over min(Fin, Fout)
            # columns. W is applied in-kernel when Fin <= Fout, else XW is
            # pre-multiplied here (small N x Fin x Fout matmul).
            apply_w = fin <= fout
            if apply_w:
                m_p, w_arg = h_pad, w_pad
            else:
                m_p = jnp.dot(h_pad, w_pad,
                              preferred_element_type=jnp.float32
                              ).astype(jnp.bfloat16)
                w_arg = None

            h_pad, e_parts = gcn_layer(
                a_p, m_p, w_arg, b_pad, p_p,
                apply_relu=(i in self.relu_layers_index), tm=tm, tk=tk)
            # TODO(synk): dropout not applied (dropout_rate=0.0 / eval mode
            # => identity).
            embeddings.append(e_parts.sum(axis=0)[:, :fout])
        return embeddings


# -------------------------------- reference --------------------------------

def reference_embeddings(x, a_hat, pool, weights, biases, relu_idx):
    out = x
    embs = []
    for i, (w, b) in enumerate(zip(weights, biases)):
        out = a_hat @ (out @ w) + b
        if i in relu_idx:
            out = jnp.maximum(out, 0.0)
        embs.append(pool @ out)
    return embs


def make_chain_graphs(key, n_per_graph, n_graphs, feat):
    """Bidirectional chain graphs, deterministic features / edge weights."""
    k_x, k_w = jax.random.split(key)
    n = n_per_graph * n_graphs
    x = jax.random.normal(k_x, (n, feat), jnp.float32)
    src, dst = [], []
    for g in range(n_graphs):
        base = g * n_per_graph
        for i in range(n_per_graph - 1):
            src += [base + i, base + i + 1]
            dst += [base + i + 1, base + i]
    edge_index = jnp.array([src, dst], dtype=jnp.int32)
    edge_weight = jax.random.uniform(k_w, (edge_index.shape[1],), jnp.float32,
                                     0.5, 1.5)
    batch = jnp.array(sum([[g] * n_per_graph for g in range(n_graphs)], []),
                      dtype=jnp.int32)
    return x, edge_index, edge_weight, batch


if __name__ == "__main__":
    root = jax.random.PRNGKey(0)
    k_data1, k_params1, k_data2, k_params2 = jax.random.split(root, 4)

    # ---- case 1: small (2 graphs x 8 nodes, feat 8, dims [8, 32, 32]) ----
    x, edge_index, edge_weight, batch = make_chain_graphs(
        k_data1, n_per_graph=8, n_graphs=2, feat=8)
    block = GCNBlock(gcn_layers_dim=[8, 32, 32], key=k_params1,
                     relu_layers_index=[0])
    embeddings = block(x, edge_index, edge_weight, batch, num_graphs=2)
    for e in embeddings:
        jax.block_until_ready(e)
    assert len(embeddings) == 2
    assert embeddings[0].shape == (2, 32) and embeddings[1].shape == (2, 32)

    a_hat = build_normalized_adjacency(edge_index, edge_weight, x.shape[0])
    pool = build_mean_pool_matrix(batch, 2)
    refs = reference_embeddings(x, a_hat, pool, block.weights, block.biases,
                                block.relu_layers_index)
    for got, want in zip(embeddings, refs):
        np.testing.assert_allclose(np.asarray(got), np.asarray(want),
                                   rtol=3e-2, atol=3e-2)

    # ---- case 2: larger, forces a real multi-tile grid (row + K tiles),
    #      exercises both apply_w paths (16<=48, 48>32), the VMEM-resident M
    #      path, the carried-padded-H path and the partial-pool sum.
    x2, ei2, ew2, batch2 = make_chain_graphs(
        k_data2, n_per_graph=160, n_graphs=2, feat=16)
    block2 = GCNBlock(gcn_layers_dim=[16, 48, 32], key=k_params2,
                      relu_layers_index=[0])
    embeddings2 = block2(x2, ei2, ew2, batch2, num_graphs=2,
                         tile_m=128, tile_k=128)
    for e in embeddings2:
        jax.block_until_ready(e)
    assert embeddings2[0].shape == (2, 48) and embeddings2[1].shape == (2, 32)

    a_hat2 = build_normalized_adjacency(ei2, ew2, x2.shape[0])
    pool2 = build_mean_pool_matrix(batch2, 2)
    refs2 = reference_embeddings(x2, a_hat2, pool2, block2.weights,
                                 block2.biases, block2.relu_layers_index)
    for got, want in zip(embeddings2, refs2):
        np.testing.assert_allclose(np.asarray(got), np.asarray(want),
                                   rtol=3e-2, atol=3e-2)

    # ---- case 3: default large tiles on a mid-size batch (sanity) ----
    x3, ei3, ew3, batch3 = make_chain_graphs(
        k_data2, n_per_graph=300, n_graphs=2, feat=16)
    block3 = GCNBlock(gcn_layers_dim=[16, 32], key=k_params1,
                      relu_layers_index=[0])
    emb3 = block3(x3, ei3, ew3, batch3, num_graphs=2)
    jax.block_until_ready(emb3[0])
    a_hat3 = build_normalized_adjacency(ei3, ew3, x3.shape[0])
    pool3 = build_mean_pool_matrix(batch3, 2)
    refs3 = reference_embeddings(x3, a_hat3, pool3, block3.weights,
                                 block3.biases, block3.relu_layers_index)
    np.testing.assert_allclose(np.asarray(emb3[0]), np.asarray(refs3[0]),
                               rtol=3e-2, atol=3e-2)

    print("KERNEL_OK")
</pallas_src>

<mosaic_0001>
module attributes {stable_mosaic.version = 11 : i64} {
  func.func @_gcn_layer_kernel(%arg0: i32, %arg1: i32, %arg2: memref<128x128xbf16, #tpu.memory_space<vmem>>, %arg3: memref<128x128xbf16, #tpu.memory_space<vmem>>, %arg4: memref<128x128xbf16, #tpu.memory_space<vmem>>, %arg5: memref<1x128xf32, #tpu.memory_space<vmem>>, %arg6: memref<2x128xf32, #tpu.memory_space<vmem>>, %arg7: memref<128x128xbf16, #tpu.memory_space<vmem>>, %arg8: memref<1x2x128xf32, #tpu.memory_space<vmem>>, %arg9: memref<128x128xf32, #tpu.memory_space<vmem>>) attributes {dimension_semantics = [#tpu.dimension_semantics<parallel>, #tpu.dimension_semantics<arbitrary>], iteration_bounds = array<i64: 1, 1>, scalar_prefetch = 0 : i64, scratch_operands = 1 : i64, tpu.core_type = #tpu.core_type<tc>, window_params = [{transform_indices = @transform_0, window_bounds = array<i64: 128, 128>}, {pipeline_mode = #tpu.pipeline_mode<synchronous>, transform_indices = @transform_1, window_bounds = array<i64: 128, 128>}, {pipeline_mode = #tpu.pipeline_mode<synchronous>, transform_indices = @transform_2, window_bounds = array<i64: 128, 128>}, {pipeline_mode = #tpu.pipeline_mode<synchronous>, transform_indices = @transform_3, window_bounds = array<i64: 1, 128>}, {transform_indices = @transform_4, window_bounds = array<i64: 2, 128>}, {transform_indices = @transform_5, window_bounds = array<i64: 128, 128>}, {transform_indices = @transform_6, window_bounds = array<i64: 1, 2, 128>}]} {
    %c0_i32 = arith.constant 0 : i32
    %0 = arith.cmpi eq, %arg1, %c0_i32 : i32
    %1 = arith.extui %0 : i1 to i32
    %c0_i32_0 = arith.constant 0 : i32
    %2 = arith.cmpi ne, %1, %c0_i32_0 : i32
    scf.if %2 {
      %cst_9 = arith.constant 0.000000e+00 : f32
      %15 = vector.broadcast %cst_9 : f32 to vector<128x128xf32>
      %c0_10 = arith.constant 0 : index
      %c0_11 = arith.constant 0 : index
      %16 = vector.load %arg9[%c0_10, %c0_11] : memref<128x128xf32, #tpu.memory_space<vmem>>, vector<128x128xf32>
      tpu.vector_store %arg9[%c0_10, %c0_11], %15 {strides = array<i32>} : memref<128x128xf32, #tpu.memory_space<vmem>>, vector<128x128xf32>,
    } else {
    }
    %c128_i32 = arith.constant 128 : i32
    %3 = arith.muli %arg1, %c128_i32 : i32
    %4 = tpu.assume_multiple %3, 128 : i32
    %5 = arith.index_cast %4 : i32 to index
    %c0 = arith.constant 0 : index
    %6 = vector.load %arg3[%5, %c0] : memref<128x128xbf16, #tpu.memory_space<vmem>>, vector<128x128xbf16>
    %c0_1 = arith.constant 0 : index
    %c0_2 = arith.constant 0 : index
    %7 = vector.load %arg9[%c0_1, %c0_2] : memref<128x128xf32, #tpu.memory_space<vmem>>, vector<128x128xf32>
    %c0_3 = arith.constant 0 : index
    %c0_4 = arith.constant 0 : index
    %8 = vector.load %arg2[%c0_3, %c0_4] : memref<128x128xbf16, #tpu.memory_space<vmem>>, vector<128x128xbf16>
    %cst = arith.constant dense<0.000000e+00> : vector<128x128xf32>
    %9 = tpu.matmul %8, %6, %cst {dimension_numbers = #tpu.dot_dimension_numbers<[1], [0], [0], [1], [0, 0, 1, 1], [], []>} : vector<128x128xbf16>, vector<128x128xbf16>, vector<128x128xf32> -> vector<128x128xf32>
    %10 = arith.addf %7, %9 : vector<128x128xf32>
    %c0_5 = arith.constant 0 : index
    %c0_6 = arith.constant 0 : index
    %11 = vector.load %arg9[%c0_5, %c0_6] : memref<128x128xf32, #tpu.memory_space<vmem>>, vector<128x128xf32>
    tpu.vector_store %arg9[%c0_5, %c0_6], %10 {strides = array<i32>} : memref<128x128xf32, #tpu.memory_space<vmem>>, vector<128x128xf32>,
    %c0_i32_7 = arith.constant 0 : i32
    %12 = arith.cmpi eq, %arg1, %c0_i32_7 : i32
    %13 = arith.extui %12 : i1 to i32
    %c0_i32_8 = arith.constant 0 : i32
    %14 = arith.cmpi ne, %13, %c0_i32_8 : i32
    scf.if %14 {
      %c0_9 = arith.constant 0 : index
      %c0_10 = arith.constant 0 : index
      %15 = vector.load %arg9[%c0_9, %c0_10] : memref<128x128xf32, #tpu.memory_space<vmem>>, vector<128x128xf32>
      %16 = arith.truncf %15 : vector<128x128xf32> to vector<128x128xbf16>
      %c0_11 = arith.constant 0 : index
      %c0_12 = arith.constant 0 : index
      %17 = vector.load %arg4[%c0_11, %c0_12] : memref<128x128xbf16, #tpu.memory_space<vmem>>, vector<128x128xbf16>
      %cst_13 = arith.constant dense<0.000000e+00> : vector<128x128xf32>
      %18 = tpu.matmul %16, %17, %cst_13 {dimension_numbers = #tpu.dot_dimension_numbers<[1], [0], [0], [1], [0, 0, 1, 1], [], []>} : vector<128x128xbf16>, vector<128x128xbf16>, vector<128x128xf32> -> vector<128x128xf32>
      %c0_14 = arith.constant 0 : index
      %c0_15 = arith.constant 0 : index
      %19 = vector.load %arg5[%c0_14, %c0_15] : memref<1x128xf32, #tpu.memory_space<vmem>>, vector<1x128xf32>
      %20 = vector.broadcast %19 : vector<1x128xf32> to vector<128x128xf32>
      %21 = arith.addf %18, %20 : vector<128x128xf32>
      %cst_16 = arith.constant 0.000000e+00 : f32
      %22 = vector.broadcast %cst_16 : f32 to vector<128x128xf32>
      %23 = arith.maximumf %21, %22 : vector<128x128xf32>
      %24 = arith.truncf %23 : vector<128x128xf32> to vector<128x128xbf16>
      %c0_17 = arith.constant 0 : index
      %c0_18 = arith.constant 0 : index
      %25 = vector.load %arg7[%c0_17, %c0_18] : memref<128x128xbf16, #tpu.memory_space<vmem>>, vector<128x128xbf16>
      tpu.vector_store %arg7[%c0_17, %c0_18], %24 {strides = array<i32>} : memref<128x128xbf16, #tpu.memory_space<vmem>>, vector<128x128xbf16>,
      %c0_19 = arith.constant 0 : index
      %c0_20 = arith.constant 0 : index
      %26 = vector.load %arg6[%c0_19, %c0_20] : memref<2x128xf32, #tpu.memory_space<vmem>>, vector<2x128xf32>
      %cst_21 = arith.constant dense<0.000000e+00> : vector<2x128xf32>
      %27 = tpu.matmul %26, %23, %cst_21 {dimension_numbers = #tpu.dot_dimension_numbers<[1], [0], [0], [1], [0, 0, 1, 1], [], []>} : vector<2x128xf32>, vector<128x128xf32>, vector<2x128xf32> -> vector<2x128xf32>
      %28 = vector.shape_cast %27 : vector<2x128xf32> to vector<1x2x128xf32>
      %c0_22 = arith.constant 0 : index
      %c0_23 = arith.constant 0 : index
      %c0_24 = arith.constant 0 : index
      %29 = vector.load %arg8[%c0_22, %c0_23, %c0_24] : memref<1x2x128xf32, #tpu.memory_space<vmem>>, vector<1x2x128xf32>
      tpu.vector_store %arg8[%c0_22, %c0_23, %c0_24], %28 {strides = array<i32>} : memref<1x2x128xf32, #tpu.memory_space<vmem>>, vector<1x2x128xf32>,
    } else {
    }
    return
  }
  func.func @transform_0(%arg0: i32, %arg1: i32) -> (i32, i32) {
    %c0_i32 = arith.constant 0 : i32
    return %arg0, %arg1 : i32, i32
  }
  func.func @transform_1(%arg0: i32, %arg1: i32) -> (i32, i32) {
    %c0_i32 = arith.constant 0 : i32
    %c0_i32_0 = arith.constant 0 : i32
    %c0_i32_1 = arith.constant 0 : i32
    return %c0_i32, %c0_i32_0 : i32, i32
  }
  func.func @transform_2(%arg0: i32, %arg1: i32) -> (i32, i32) {
    %c0_i32 = arith.constant 0 : i32
    %c0_i32_0 = arith.constant 0 : i32
    %c0_i32_1 = arith.constant 0 : i32
    return %c0_i32, %c0_i32_0 : i32, i32
  }
  func.func @transform_3(%arg0: i32, %arg1: i32) -> (i32, i32) {
    %c0_i32 = arith.constant 0 : i32
    %c0_i32_0 = arith.constant 0 : i32
    %c0_i32_1 = arith.constant 0 : i32
    return %c0_i32, %c0_i32_0 : i32, i32
  }
  func.func @transform_4(%arg0: i32, %arg1: i32) -> (i32, i32) {
    %c0_i32 = arith.constant 0 : i32
    %c0_i32_0 = arith.constant 0 : i32
    return %c0_i32, %arg0 : i32, i32
  }
  func.func @transform_5(%arg0: i32, %arg1: i32) -> (i32, i32) {
    %c0_i32 = arith.constant 0 : i32
    %c0_i32_0 = arith.constant 0 : i32
    return %arg0, %c0_i32 : i32, i32
  }
  func.func @transform_6(%arg0: i32, %arg1: i32) -> (i32, i32, i32) {
    %c0_i32 = arith.constant 0 : i32
    %c0_i32_0 = arith.constant 0 : i32
    %c0_i32_1 = arith.constant 0 : i32
    return %arg0, %c0_i32, %c0_i32_0 : i32, i32, i32
  }
}

</mosaic_0001>

<bundles_post_ra>
// kernel: tpu_custom_call.1
= control target key start
LH: loop header
LB: loop body
LE: loop exit
PB: predicated region body
PF: predicated region fallthrough
CT: control target
= control target key end

     0   :  { %12 = vsyncpa [#allocation4], 0  ;;  %s1345_s0 = inlined_call_operand.hbm [shape: bf16[128,128], index: 0, kind: input, shape index: {}]   ;;  %s1346_s1 = inlined_call_operand.hbm [shape: bf16[128,128], index: 1, kind: input, shape index: {}]   ;;  %s1347_s2 = inlined_call_operand.hbm [shape: bf16[128,128], index: 2, kind: input, shape index: {}]   ;;  %s1348_s3 = inlined_call_operand.vmem [shape: f32[1,128], index: 3, kind: input, shape index: {}]   ;;  %s1349_s4 = inlined_call_operand.vmem [shape: f32[2,128], index: 4, kind: input, shape index: {}]   ;;  %s1350_s5 = inlined_call_operand.hbm [shape: bf16[128,128], index: 5, kind: output, shape index: {0}]   ;;  %s1351_s6 = inlined_call_operand.hbm [shape: f32[1,2,128], index: 6, kind: output, shape index: {1}]  }
   0x1   :  { %13 = vsyncpa [#allocation7], 0 }
   0x2   :  { %14 = vsyncpa [#allocation5], 0 }
   0x3   :  { %15 = vsyncpa [#allocation11], 0  ;;  %s1189_s21 = smov [#allocation6]   ;;  %s1190_s23 = smov [#allocation3]  }
   0x4   :  { %s33_s22 = sshll.u32 %s1189_s21, 4  ;;  %s21_s24 = sshll.u32 %s1190_s23, 4  ;;  %s34_s22 = int_to_ptr.vmem [resolvable:$true] %s33_s22  ;;  %s1234_s24 = int_to_ptr.vmem [resolvable:$true] %s21_s24 }
   0x5   :  { %s1071_s27 = scalar_lea.hbm %s1346_s1, 1024 }
   0x6   :  { %p1072_p0 = scmp.ne.s32.totalorder %s1346_s1, %s1071_s27  ;;  %p1075_p1 = scmp.lt.u32.totalorder %s1071_s27, %s1346_s1 }
   0x8   :  { %p1077_p2 = pnand %p1075_p1, %p1072_p0 }
   0xa   :  { %1080 = shalt.err (!%p1077_p2)
}
   0xb   :  { %s1081_s8 = scalar_lea.vmem %s34_s22, 1024  ;;  %p1086_p4 = scmp.lt.s32.totalorder %s34_s22, %s34_s22 }
   0xc   :  { %p1082_p3 = scmp.ne.s32.totalorder %s34_s22, %s1081_s8  ;;  %p1087_p5 = scmp.lt.s32.totalorder %s1081_s8, %s1081_s8 }
   0xe   :  { %p1088_p6 = por %p1087_p5, %p1086_p4 }
  0x10   :  { %p1089_p7 = pnand %p1088_p6, %p1082_p3 }
  0x12   :  { %1092 = shalt.err (!%p1089_p7)
}
  0x13   :  { %s1191_s9 = smov 64   ;;  %s1192_s10 = smov 4  }
  0x14   :  { %39 = dma.hbm_to_vmem [thread:$0]  %s1346_s1, 1024, %s34_s22, [#allocation7], %s1191_s9, %s1191_s9, %s1192_s10  }
  0x15   :  { %s1093_s15 = scalar_lea.hbm %s1345_s0, 1024 }
  0x16   :  { %p1094_p8 = scmp.ne.s32.totalorder %s1345_s0, %s1093_s15  ;;  %p1097_p9 = scmp.lt.u32.totalorder %s1093_s15, %s1345_s0 }
  0x18   :  { %p1099_p10 = pnand %p1097_p9, %p1094_p8 }
  0x1a   :  { %1102 = shalt.err (!%p1099_p10)
}
  0x1b   :  { %s1103_s20 = scalar_lea.vmem %s1234_s24, 1024  ;;  %p1108_p12 = scmp.lt.s32.totalorder %s1234_s24, %s1234_s24 }
  0x1c   :  { %p1104_p11 = scmp.ne.s32.totalorder %s1234_s24, %s1103_s20  ;;  %p1109_p13 = scmp.lt.s32.totalorder %s1103_s20, %s1103_s20 }
  0x1e   :  { %p1110_p0 = por %p1109_p13, %p1108_p12 }
  0x20   :  { %p1111_p1 = pnand %p1110_p0, %p1104_p11 }
  0x22   :  { %1114 = shalt.err (!%p1111_p1)
}
  0x23   :  { %27 = dma.hbm_to_vmem [thread:$0]  %s1345_s0, 1024, %s1234_s24, [#allocation4], %s1191_s9, %s1191_s9, %s1192_s10  }
  0x24   :  { %s1193_s22 = smov [#allocation8]   ;;  %s1115_s27 = scalar_lea.hbm %s1347_s2, 1024 }
  0x25   :  { %s45_s23 = sshll.u32 %s1193_s22, 4  ;;  %p1116_p2 = scmp.ne.s32.totalorder %s1347_s2, %s1115_s27  ;;  %s46_s23 = int_to_ptr.vmem [resolvable:$true] %s45_s23 }
  0x26   :  { %p1119_p3 = scmp.lt.u32.totalorder %s1115_s27, %s1347_s2 }
  0x28   :  { %p1121_p4 = pnand %p1119_p3, %p1116_p2 }
  0x2a   :  { %1124 = shalt.err (!%p1121_p4)
}
  0x2b   :  { %s1125_s8 = scalar_lea.vmem %s46_s23, 1024  ;;  %p1130_p6 = scmp.lt.s32.totalorder %s46_s23, %s46_s23 }
  0x2c   :  { %p1126_p5 = scmp.ne.s32.totalorder %s46_s23, %s1125_s8  ;;  %p1131_p7 = scmp.lt.s32.totalorder %s1125_s8, %s1125_s8 }
  0x2e   :  { %p1132_p8 = por %p1131_p7, %p1130_p6 }
  0x30   :  { %p1133_p9 = pnand %p1132_p8, %p1126_p5 }
  0x32   :  { %1136 = shalt.err (!%p1133_p9)
}
  0x33   :  { %51 = dma.hbm_to_vmem [thread:$0]  %s1347_s2, 1024, %s46_s23, [#allocation7], %s1191_s9, %s1191_s9, %s1192_s10  }
  0x34   :  { %1181 = dma.done.wait [#allocation4], 1024  }
  0x35   :  { %1182 = vsyncadd [#allocation4], 4294966272 }
  0x36   :  { %1183 = dma.done.wait [#allocation7], 2048  }
  0x37   :  { %1184 = vsyncadd [#allocation7], 4294965248  ;;  %v1047_v0 = vld [vmem:[#allocation6] sm:$0xff]   ;;  %v1048_v1 = vld [vmem:[#allocation6 + $0x8] sm:$0xff]   ;;  %v1194_v48 = vmov 0.0|0.0   ;;  %vm1195_vm0 = vmmov 0  }
  0x38   :  { %914 = vmatprep.subr.bf16.mxu0 %v1047_v0  ;;  %v1049_v2 = vld [vmem:[#allocation6 + $0x10] sm:$0xff]   ;;  %v1050_v3 = vld [vmem:[#allocation6 + $0x18] sm:$0xff]   ;;  %v1055_v4 = vld [vmem:[#allocation3] sm:$0xff]   ;;  %v1196_v49 = vmov 0.0   ;;  %s1197_s13 = smov [#allocation9]  }
  0x39   :  { %915 = vmatpush3.bf16.msra.mxu0 %v1047_v0  ;;  %930 = vmatprep.mubr.bf16.mxu0 %v1055_v4  ;;  %v1051_v5 = vld [vmem:[#allocation6 + $0x20] sm:$0xff]   ;;  %v1052_v6 = vld [vmem:[#allocation6 + $0x28] sm:$0xff]   ;;  %v1053_v9 = vld [vmem:[#allocation6 + $0x30] sm:$0xff]   ;;  %s732_s14 = sshll.u32 %s1197_s13, 4  ;;  %s733_s14 = int_to_ptr.vmem [resolvable:$true] %s732_s14 }
  0x3a   :  { %916 = vmatprep.subr.bf16.mxu0 %v1048_v1  ;;  %v1063_v7 = vld [vmem:[#allocation8] sm:$0xff]   ;;  %v1064_v8 = vld [vmem:[#allocation8 + $0x8] sm:$0xff]   ;;  %v1065_v10 = vld [vmem:[#allocation8 + $0x10] sm:$0xff]   ;;  %s1137_s15 = scalar_lea.vmem %s733_s14, 1024  ;;  %p1142_p11 = scmp.lt.s32.totalorder %s733_s14, %s733_s14 }
  0x3b   :  { %946 = vmatprep.subr.bf16.mxu1 %v1063_v7  ;;  %v1054_v11 = vld [vmem:[#allocation6 + $0x38] sm:$0xff]   ;;  %v1067_v13 = vld [vmem:[#allocation8 + $0x20] sm:$0xff]   ;;  %v1056_v14 = vld [vmem:[#allocation3 + $0x8] sm:$0xff]   ;;  %p1138_p10 = scmp.ne.s32.totalorder %s733_s14, %s1137_s15  ;;  %p1143_p12 = scmp.lt.s32.totalorder %s1137_s15, %s1137_s15 }
  0x3c   :  { %947 = vmatpush3.bf16.msra.mxu1 %v1063_v7  ;;  %v1066_v12 = vld [vmem:[#allocation8 + $0x18] sm:$0xff]   ;;  %v1057_v15 = vld [vmem:[#allocation3 + $0x10] sm:$0xff]   ;;  %v1068_v16 = vld [vmem:[#allocation8 + $0x28] sm:$0xff]  }
  0x3d   :  { %917 = vmatpush3.bf16.msra.mxu0 %v1048_v1  ;;  %948 = vmatprep.subr.bf16.mxu1 %v1064_v8  ;;  %v1069_v17 = vld [vmem:[#allocation8 + $0x30] sm:$0xff]   ;;  %v1058_v18 = vld [vmem:[#allocation3 + $0x18] sm:$0xff]   ;;  %v1059_v19 = vld [vmem:[#allocation3 + $0x20] sm:$0xff]   ;;  %p1144_p13 = por %p1143_p12, %p1142_p11 }
  0x3e   :  { %918 = vmatprep.subr.bf16.mxu0 %v1049_v2  ;;  %v1060_v20 = vld [vmem:[#allocation3 + $0x28] sm:$0xff]   ;;  %v1061_v21 = vld [vmem:[#allocation3 + $0x30] sm:$0xff]   ;;  %v1062_v22 = vld [vmem:[#allocation3 + $0x38] sm:$0xff]  }
  0x3f   :  { %v1070_v23 = vld [vmem:[#allocation8 + $0x38] sm:$0xff]   ;;  %v1290_v50 = vld [vmem:[%s1348_s3] ss:$0 sm:$0xff]  ;;  %p1145_p0 = pnand %p1144_p13, %p1138_p10 }
  0x40   :  { %949 = vmatpush3.bf16.msra.mxu1 %v1064_v8 }
  0x41   :  { %919 = vmatpush3.bf16.msra.mxu0 %v1049_v2  ;;  %950 = vmatprep.subr.bf16.mxu1 %v1065_v10 }
  0x42   :  { %920 = vmatprep.subr.bf16.mxu0 %v1050_v3 }
  0x44   :  { %951 = vmatpush3.bf16.msra.mxu1 %v1065_v10 }
  0x45   :  { %921 = vmatpush3.bf16.msra.mxu0 %v1050_v3  ;;  %952 = vmatprep.subr.bf16.mxu1 %v1066_v12 }
  0x46   :  { %922 = vmatprep.subr.bf16.mxu0 %v1051_v5 }
  0x48   :  { %953 = vmatpush3.bf16.msra.mxu1 %v1066_v12 }
  0x49   :  { %923 = vmatpush3.bf16.msra.mxu0 %v1051_v5  ;;  %954 = vmatprep.subr.bf16.mxu1 %v1067_v13 }
  0x4a   :  { %924 = vmatprep.subr.bf16.mxu0 %v1052_v6 }
  0x4c   :  { %955 = vmatpush3.bf16.msra.mxu1 %v1067_v13 }
  0x4d   :  { %925 = vmatpush3.bf16.msra.mxu0 %v1052_v6  ;;  %956 = vmatprep.subr.bf16.mxu1 %v1068_v16 }
  0x4e   :  { %926 = vmatprep.subr.bf16.mxu0 %v1053_v9 }
  0x50   :  { %957 = vmatpush3.bf16.msra.mxu1 %v1068_v16 }
  0x51   :  { %927 = vmatpush3.bf16.msra.mxu0 %v1053_v9  ;;  %958 = vmatprep.subr.bf16.mxu1 %v1069_v17 }
  0x52   :  { %928 = vmatprep.subr.bf16.mxu0 %v1054_v11 }
  0x54   :  { %959 = vmatpush3.bf16.msra.mxu1 %v1069_v17 }
  0x55   :  { %929 = vmatpush3.bf16.msra.mxu0 %v1054_v11  ;;  %960 = vmatprep.subr.bf16.mxu1 %v1070_v23 }
  0x56   :  { %1013 = vmatprep.subr.bf16.mxu0 %v1194_v48 }
  0x58   :  { %931 = vmatmul.mubr.bf16.vlgmr.msra.gmra.mrb[0].mxu0 %v1056_v14  ;;  %961 = vmatpush3.bf16.msra.mxu1 %v1070_v23 }
  0x59   :  { %934 = vmatprep.mubr.bf16.mxu0 %v1057_v15 }
  0x60   :  { %935 = vmatmul.mubr.bf16.gmra.mrb[4].mxu0 %v1058_v18 }
  0x61   :  { %938 = vmatprep.mubr.bf16.mxu0 %v1059_v19 }
  0x68   :  { %939 = vmatmul.mubr.bf16.gmra.mrb[8].mxu0 %v1060_v20 }
  0x69   :  { %942 = vmatprep.mubr.bf16.mxu0 %v1061_v21 }
  0x70   :  { %943 = vmatmul.mubr.bf16.gmra.mrb[12].mxu0 %v1062_v22 }
  0x71   :  { %1010 = vmatprep.mubr.msk.f32.mxu0 %vm1195_vm0, %v1196_v49 }
 0x12b   :  { %v932_v24 = vpop.f32.mrb[0].mxu0 }
 0x12c   :  { %v269_v25 = vpop.f32.mrb[1].mxu0 }
 0x12d   :  { %v933_v26 = vpop.f32.mrb[2].mxu0 }
 0x12e   :  { %v384_v27 = vpack.c.bf16 %v933_v26, %v932_v24  ;;  %v272_v28 = vpop.f32.mrb[3].mxu0 }
 0x12f   :  { %v383_v29 = vpack.c.bf16 %v272_v28, %v269_v25 }
 0x131   :  { %962 = vmatprep.mubr.bf16.mxu1 %v383_v29 }
 0x132   :  { %963 = vmatmul.mubr.bf16.vlgmr.msra.gmra.mrb[0].mxu1 %v384_v27 }
 0x133   :  { %v936_v30 = vpop.f32.mrb[4].mxu0 }
 0x134   :  { %v285_v31 = vpop.f32.mrb[5].mxu0 }
 0x135   :  { %v937_v32 = vpop.f32.mrb[6].mxu0 }
 0x136   :  { %v386_v33 = vpack.c.bf16 %v937_v32, %v936_v30  ;;  %v288_v34 = vpop.f32.mrb[7].mxu0 }
 0x137   :  { %v385_v35 = vpack.c.bf16 %v288_v34, %v285_v31 }
 0x139   :  { %966 = vmatprep.mubr.bf16.mxu1 %v385_v35 }
 0x13a   :  { %967 = vmatmul.mubr.bf16.gmra.mrb[4].mxu1 %v386_v33 }
 0x13b   :  { %v940_v36 = vpop.f32.mrb[8].mxu0 }
 0x13c   :  { %v301_v37 = vpop.f32.mrb[9].mxu0 }
 0x13d   :  { %v941_v38 = vpop.f32.mrb[10].mxu0 }
 0x13e   :  { %v388_v39 = vpack.c.bf16 %v941_v38, %v940_v36  ;;  %v304_v40 = vpop.f32.mrb[11].mxu0 }
 0x13f   :  { %v387_v41 = vpack.c.bf16 %v304_v40, %v301_v37 }
 0x141   :  { %970 = vmatprep.mubr.bf16.mxu1 %v387_v41 }
 0x142   :  { %971 = vmatmul.mubr.bf16.gmra.mrb[8].mxu1 %v388_v39 }
 0x143   :  { %v944_v42 = vpop.f32.mrb[12].mxu0 }
 0x144   :  { %v317_v43 = vpop.f32.mrb[13].mxu0 }
 0x145   :  { %v945_v44 = vpop.f32.mrb[14].mxu0 }
 0x146   :  { %v390_v45 = vpack.c.bf16 %v945_v44, %v944_v42  ;;  %v320_v46 = vpop.f32.mrb[15].mxu0 }
 0x147   :  { %v389_v47 = vpack.c.bf16 %v320_v46, %v317_v43  ;;  %v655_v43 = vld [vmem:[%s1349_s4] sm:$0x3] }
 0x149   :  { %974 = vmatprep.mubr.bf16.mxu1 %v389_v47 }
 0x14a   :  { %975 = vmatmul.mubr.bf16.gmra.mrb[12].mxu1 %v390_v45 }
 0x205   :  { %v964_v51 = vpop.f32.mrb[0].mxu1 }
 0x206   :  { %v505_v52 = vadd.f32 %v964_v51, %v1290_v50  ;;  %v496_v53 = vpop.f32.mrb[1].mxu1 }
 0x207   :  { %v497_v54 = vadd.f32 %v1290_v50, %v496_v53  ;;  %v965_v55 = vpop.f32.mrb[2].mxu1 }
 0x208   :  { %v508_v56 = vadd.f32 %v965_v55, %v1290_v50  ;;  %v499_v57 = vpop.f32.mrb[3].mxu1  ;;  %v561_v59 = vmax.f32 %v505_v52, 0.0 }
 0x209   :  { %v500_v58 = vadd.f32 %v1290_v50, %v499_v57  ;;  %v559_v61 = vmax.f32 %v497_v54, 0.0 }
 0x20a   :  { %v562_v60 = vmax.f32 %v508_v56, 0.0 }
 0x20b   :  { %v560_v62 = vmax.f32 %v500_v58, 0.0 }
 0x20c   :  { %v826_v63 = vpack.c.bf16 %v562_v60, %v561_v59 }
 0x20d   :  { %v821_v0 = vpack.c.bf16 %v560_v62, %v559_v61  ;;  %v968_v1 = vpop.f32.mrb[4].mxu1 }
 0x20e   :  { %858 = vst [vmem:[#allocation9 + $0x8] sm:$0xff] %v826_v63   ;;  %v521_v2 = vadd.f32 %v968_v1, %v1290_v50  ;;  %v512_v3 = vpop.f32.mrb[5].mxu1 }
 0x20f   :  { %822 = vst [vmem:[#allocation9] sm:$0xff] %v821_v0   ;;  %v513_v4 = vadd.f32 %v1290_v50, %v512_v3  ;;  %v969_v5 = vpop.f32.mrb[6].mxu1  ;;  %1015 = vmatpush3.bf16.msra.mxu0 %v821_v0 }
 0x210   :  { %v524_v6 = vadd.f32 %v969_v5, %v1290_v50  ;;  %v515_v7 = vpop.f32.mrb[7].mxu1  ;;  %1016 = vmatprep.subr.bf16.mxu0 %v1194_v48  ;;  %v565_v9 = vmax.f32 %v521_v2, 0.0 }
 0x211   :  { %v516_v8 = vadd.f32 %v1290_v50, %v515_v7  ;;  %v563_v11 = vmax.f32 %v513_v4, 0.0 }
 0x212   :  { %v566_v10 = vmax.f32 %v524_v6, 0.0 }
 0x213   :  { %v564_v12 = vmax.f32 %v516_v8, 0.0  ;;  %1018 = vmatpush3.bf16.msra.mxu0 %v826_v63 }
 0x214   :  { %v836_v13 = vpack.c.bf16 %v566_v10, %v565_v9  ;;  %1019 = vmatprep.subr.bf16.mxu0 %v1194_v48 }
 0x215   :  { %v831_v14 = vpack.c.bf16 %v564_v12, %v563_v11  ;;  %v972_v15 = vpop.f32.mrb[8].mxu1 }
 0x216   :  { %860 = vst [vmem:[#allocation9 + $0x18] sm:$0xff] %v836_v13   ;;  %v537_v16 = vadd.f32 %v972_v15, %v1290_v50  ;;  %v528_v17 = vpop.f32.mrb[9].mxu1 }
 0x217   :  { %859 = vst [vmem:[#allocation9 + $0x10] sm:$0xff] %v831_v14   ;;  %v529_v18 = vadd.f32 %v1290_v50, %v528_v17  ;;  %v973_v19 = vpop.f32.mrb[10].mxu1  ;;  %1021 = vmatpush3.bf16.msra.mxu0 %v831_v14 }
 0x218   :  { %v540_v20 = vadd.f32 %v973_v19, %v1290_v50  ;;  %v531_v21 = vpop.f32.mrb[11].mxu1  ;;  %1022 = vmatprep.subr.bf16.mxu0 %v1194_v48  ;;  %v569_v23 = vmax.f32 %v537_v16, 0.0 }
 0x219   :  { %v532_v22 = vadd.f32 %v1290_v50, %v531_v21  ;;  %v567_v25 = vmax.f32 %v529_v18, 0.0 }
 0x21a   :  { %v570_v24 = vmax.f32 %v540_v20, 0.0 }
 0x21b   :  { %v568_v26 = vmax.f32 %v532_v22, 0.0  ;;  %1024 = vmatpush3.bf16.msra.mxu0 %v836_v13 }
 0x21c   :  { %v846_v27 = vpack.c.bf16 %v570_v24, %v569_v23  ;;  %1025 = vmatprep.subr.bf16.mxu0 %v1194_v48 }
 0x21d   :  { %v841_v28 = vpack.c.bf16 %v568_v26, %v567_v25  ;;  %v976_v29 = vpop.f32.mrb[12].mxu1 }
 0x21e   :  { %862 = vst [vmem:[#allocation9 + $0x28] sm:$0xff] %v846_v27   ;;  %v553_v30 = vadd.f32 %v976_v29, %v1290_v50  ;;  %v544_v31 = vpop.f32.mrb[13].mxu1 }
 0x21f   :  { %861 = vst [vmem:[#allocation9 + $0x20] sm:$0xff] %v841_v28   ;;  %v545_v32 = vadd.f32 %v1290_v50, %v544_v31  ;;  %v977_v33 = vpop.f32.mrb[14].mxu1  ;;  %1027 = vmatpush3.bf16.msra.mxu0 %v841_v28 }
 0x220   :  { %v556_v34 = vadd.f32 %v977_v33, %v1290_v50  ;;  %v547_v35 = vpop.f32.mrb[15].mxu1  ;;  %1028 = vmatprep.subr.bf16.mxu0 %v1194_v48  ;;  %v573_v37 = vmax.f32 %v553_v30, 0.0 }
 0x221   :  { %v548_v36 = vadd.f32 %v1290_v50, %v547_v35  ;;  %v571_v39 = vmax.f32 %v545_v32, 0.0 }
 0x222   :  { %v574_v38 = vmax.f32 %v556_v34, 0.0 }
 0x223   :  { %v572_v40 = vmax.f32 %v548_v36, 0.0  ;;  %1030 = vmatpush3.bf16.msra.mxu0 %v846_v27 }
 0x224   :  { %v856_v41 = vpack.c.bf16 %v574_v38, %v573_v37  ;;  %1031 = vmatprep.subr.bf16.mxu0 %v1194_v48 }
 0x225   :  { %v851_v42 = vpack.c.bf16 %v572_v40, %v571_v39 }
 0x226   :  { %864 = vst [vmem:[#allocation9 + $0x38] sm:$0xff] %v856_v41  }
 0x227   :  { %863 = vst [vmem:[#allocation9 + $0x30] sm:$0xff] %v851_v42   ;;  %1033 = vmatpush3.bf16.msra.mxu0 %v851_v42 }
 0x228   :  { %1034 = vmatprep.subr.bf16.mxu0 %v1194_v48 }
 0x22b   :  { %1036 = vmatpush3.bf16.msra.mxu0 %v856_v41 }
 0x22e   :  { %1011 = vmatmul.mubr.f32.vlgmr.msra.gmra.mrb[16].mxu0 %v655_v43 }
 0x22f   :  { %1148 = shalt.err (!%p1145_p0)
}
 0x230   :  { %s1149_s18 = scalar_lea.hbm %s1350_s5, 1024 }
 0x231   :  { %p1150_p1 = scmp.ne.s32.totalorder %s1350_s5, %s1149_s18  ;;  %p1153_p2 = scmp.lt.u32.totalorder %s1149_s18, %s1350_s5 }
 0x233   :  { %p1155_p3 = pnand %p1153_p2, %p1150_p1 }
 0x235   :  { %1158 = shalt.err (!%p1155_p3)
}
 0x236   :  { %738 = dma.vmem_to_hbm [thread:$0]  %s733_s14, 1024, %s1350_s5, [#allocation5], %s1191_s9, %s1191_s9, %s1192_s10  }
 0x237   :  { %s1198_s23 = smov [#allocation10]  }
 0x238   :  { %s745_s25 = sshll.u32 %s1198_s23, 4  ;;  %s746_s25 = int_to_ptr.vmem [resolvable:$true] %s745_s25 }
 0x239   :  { %s1159_s26 = scalar_lea.vmem %s746_s25, 32  ;;  %p1164_p5 = scmp.lt.s32.totalorder %s746_s25, %s746_s25 }
 0x23a   :  { %p1160_p4 = scmp.ne.s32.totalorder %s746_s25, %s1159_s26  ;;  %p1165_p6 = scmp.lt.s32.totalorder %s1159_s26, %s1159_s26 }
 0x23c   :  { %p1166_p7 = por %p1165_p6, %p1164_p5 }
 0x23e   :  { %p1167_p8 = pnand %p1166_p7, %p1160_p4 }
 0x301   :  { %v722_v44 = vpop.f32.mrb[16].mxu0 }
 0x302   :  { %726 = vst [vmem:[#allocation10] sm:$0x3] %v722_v44  ;;  %v1012_v45 = vpop.f32.mrb[17].mxu0 }
 0x303   :  { %1170 = shalt.err (!%p1167_p8)
}
 0x304   :  { %s1171_s29 = scalar_lea.hbm %s1351_s6, 32 }
 0x305   :  { %p1172_p9 = scmp.ne.s32.totalorder %s1351_s6, %s1171_s29  ;;  %p1175_p10 = scmp.lt.u32.totalorder %s1171_s29, %s1351_s6 }
 0x307   :  { %p1177_p11 = pnand %p1175_p10, %p1172_p9 }
 0x309   :  { %1180 = shalt.err (!%p1177_p11)
}
 0x30a   :  { %748 = dma.vmem_to_hbm [thread:$0]  %s746_s25, 32, %s1351_s6, [#allocation11]  }
 0x30b   :  { %1185 = dma.done.wait [#allocation5], 1024  }
 0x30c   :  { %1186 = vsyncadd [#allocation5], 4294966272 }
 0x30d   :  { %1187 = dma.done.wait [#allocation11], 32  }
 0x30e   :  { %1188 = vsyncadd [#allocation11], 4294967264 }
 0x30f   :  { %755 = vsyncpa [#allocation4], 1 }
 0x310   :  { %756 = vsyncpa [#allocation7], 1 }
 0x311   :  { %757 = vsyncpa [#allocation5], 1 }
 0x312   :  { %758 = vsyncpa [#allocation11], 1 }

</bundles_post_ra>
